<compile_context>
chip_gen: v7x
topology: tpu7x:2x2x1
jax: 0.10.0
libtpu: 0.0.40
codegen_flags: <defaults>
</compile_context>

<pallas_src>
import functools
import math

import jax
import jax.numpy as jnp
from jax.experimental import pallas as pl
from jax.experimental.pallas import tpu as pltpu

_SQRT2_INV = 1.0 / math.sqrt(2.0)
_LN_EPS = 1e-5


def _gelu_exact(x):
    # matches torch.nn.functional.gelu (erf-based, non-approximate)
    return 0.5 * x * (1.0 + jax.lax.erf(x * _SQRT2_INV))


def _layernorm(x, gamma, beta):
    mean = jnp.mean(x, axis=-1, keepdims=True)
    var = jnp.mean(jnp.square(x - mean), axis=-1, keepdims=True)
    return (x - mean) * jax.lax.rsqrt(var + _LN_EPS) * gamma + beta


def s5block_kernel(
    x_ref,       # (TB*L, D)      f32  input rows (TB whole sequences)
    vec_ref,     # (8, D)         f32  rows: g1, b1, wdtp, lam_re, lam_im, dpar, g2, b2
    wproj_ref,   # (D, 2H+2P+1)   mm   fused [B_re | B_im | C_re | C_im | dt] projection
    wffe_ref,    # (D, 2F)        mm   fused ff_enc [value | gate]
    wdec_ref,    # (F, D)         mm   ff_dec
    y_ref,       # (TB*L, D)      f32  output rows
    st_ref,      # (TB, 2, P)     f32  final SSM state (re, im) per sequence
    *, seq_len, mm_dtype,
):
    x = x_ref[...]                                    # (n, D) f32
    n, dim = x.shape
    h = p = dim                                       # H == P == D (asserted in wrapper)
    f = wffe_ref.shape[-1] // 2
    tb = n // seq_len

    vecs = vec_ref[...]
    g1, b1 = vecs[0:1], vecs[1:2]
    wdtp = vecs[2:3]
    lam_re, lam_im = vecs[3:4], vecs[4:5]
    dpar = vecs[5:6]
    g2, b2 = vecs[6:7], vecs[7:8]

    # ---- attn_norm ---------------------------------------------------------
    fx = _layernorm(x, g1, b1)                        # (n, D) f32

    # ---- fused selective projections: ONE lane-dense MXU matmul ------------
    proj = jnp.dot(fx.astype(mm_dtype), wproj_ref[...],
                   preferred_element_type=jnp.float32)          # (n, 2H+2P+1)
    b_re = proj[:, 0:h]
    b_im = proj[:, h:2 * h]
    c_re = proj[:, 2 * h:2 * h + p]
    c_im = proj[:, 2 * h + p:2 * h + 2 * p]
    dt_raw = proj[:, 2 * h + 2 * p:2 * h + 2 * p + 1]            # (n, 1)

    step = jnp.exp(dt_raw * wdtp)                                # (n, H); step_scale = 1

    # ---- bilinear discretization -------------------------------------------
    # BL = 1/(1 - dt/2*Lambda);  Lambda_bar = BL*(1 + dt/2*Lambda);  g = BL*dt
    hs = 0.5 * step
    t_re = hs * lam_re
    t_im = hs * lam_im
    den_re = 1.0 - t_re
    den_im = -t_im
    inv_den = 1.0 / (den_re * den_re + den_im * den_im)  # exact: feeds the recurrence
    bl_re = den_re * inv_den
    bl_im = -den_im * inv_den
    num_re = 1.0 + t_re
    num_im = t_im
    lbar_re = bl_re * num_re - bl_im * num_im                    # (n, P)
    lbar_im = bl_re * num_im + bl_im * num_re
    gq_re = bl_re * step
    gq_im = bl_im * step

    # Bu[l] = B_bar[l] @ u[l];  B_tilde[l] = outer(b_re,b_re) + i*outer(b_im,b_im)
    u = fx
    bdot_re = jnp.sum(b_re * u, axis=-1, keepdims=True)          # (n, 1)
    bdot_im = jnp.sum(b_im * u, axis=-1, keepdims=True)
    btu_re = b_re * bdot_re                                      # (n, P)  (P == H)
    btu_im = b_im * bdot_im
    bu_re = gq_re * btu_re - gq_im * btu_im
    bu_im = gq_re * btu_im + gq_im * btu_re

    # ---- linear recurrence: log-depth Hillis-Steele scan over sublanes -----
    # x[l] = bu[l] + lbar[l] * x[l-1].  One scan over all TB*L rows.  A is zeroed at
    # each sequence-start row (incl. row 0): the first A of a scan never contributes to
    # any prefix, and the zero blocks both cross-sequence carry AND any wrap-around
    # contamination from the unmasked rolls (a[l] == 0 for every wrapped row at every
    # step), so no per-step masking is required.
    row_idx = jax.lax.broadcasted_iota(jnp.int32, (n, 1), 0)
    if tb == 1:
        seq_start = row_idx == 0
    else:
        seq_start = (row_idx % seq_len) == 0
    a_re = jnp.where(seq_start, 0.0, lbar_re)
    a_im = jnp.where(seq_start, 0.0, lbar_im)
    s_re = bu_re
    s_im = bu_im
    dist = 1
    while dist < n:                                   # log2(n) traced steps
        a_re_sh = pltpu.roll(a_re, dist, axis=0)
        a_im_sh = pltpu.roll(a_im, dist, axis=0)
        s_re_sh = pltpu.roll(s_re, dist, axis=0)
        s_im_sh = pltpu.roll(s_im, dist, axis=0)
        # combine: (A, b) <- (A * A_sh, b + A * b_sh)   [complex]
        new_s_re = s_re + a_re * s_re_sh - a_im * s_im_sh
        new_s_im = s_im + a_re * s_im_sh + a_im * s_re_sh
        new_a_re = a_re * a_re_sh - a_im * a_im_sh
        new_a_im = a_re * a_im_sh + a_im * a_re_sh
        a_re, a_im, s_re, s_im = new_a_re, new_a_im, new_s_re, new_s_im
        dist *= 2
    xs_re, xs_im = s_re, s_im                         # (n, P)

    # final state of each of the TB sequences, packed as one (TB, 2, P) store
    xs_re3 = xs_re.reshape(tb, seq_len, p)
    xs_im3 = xs_im.reshape(tb, seq_len, p)
    st_ref[...] = jnp.concatenate(
        [xs_re3[:, seq_len - 1:seq_len, :], xs_im3[:, seq_len - 1:seq_len, :]], axis=1)

    # y[l] = Re(C_tilde[l] @ xs[l]) + D * u[l]
    cdot_re = jnp.sum(c_re * xs_re, axis=-1, keepdims=True)
    cdot_im = jnp.sum(c_im * xs_im, axis=-1, keepdims=True)
    y_ssm = c_re * cdot_re - c_im * cdot_im + dpar * u           # (n, H)

    # ---- residual + feed-forward (GEGLU), fused encoder matmul --------------
    x2 = _gelu_exact(y_ssm) + fx
    fx2 = _layernorm(x2, g2, b2)
    ff = jnp.dot(fx2.astype(mm_dtype), wffe_ref[...],
                 preferred_element_type=jnp.float32)             # (n, 2F)
    z = ff[:, 0:f] * _gelu_exact(ff[:, f:2 * f])
    out = jnp.dot(z.astype(mm_dtype), wdec_ref[...],
                  preferred_element_type=jnp.float32) + fx2
    y_ref[...] = out


_VEC_ORDER = ("g1", "b1", "wdtp", "lam_re", "lam_im", "dpar", "g2", "b2")


def pack_params(params, matmul_dtype=jnp.bfloat16):
    """One-time packing of module params into the kernel's fused layout."""
    d = params["g1"].shape[-1]
    p = params["lam_re"].shape[-1]
    assert d == p, "reference forward requires dim == state_dim (H == P)"
    vecs = jnp.concatenate([params[k] for k in _VEC_ORDER], axis=0)         # (8, D)
    wproj = jnp.concatenate(
        [params["wbre"], params["wbim"], params["wcre"], params["wcim"],
         params["wdt_row"].T], axis=1).astype(matmul_dtype)                 # (D, 2H+2P+1)
    wffe = jnp.concatenate([params["wenca"], params["wencg"]],
                           axis=1).astype(matmul_dtype)                     # (D, 2F)
    wdec = params["wdec"].astype(matmul_dtype)                              # (F, D)
    return dict(vecs=vecs, wproj=wproj, wffe=wffe, wdec=wdec)


def s5_block_apply(x, states, packed, *, block_batch=None):
    """x: (B, L, D) f32; states: (B, P) (cannot affect outputs, see header note)."""
    del states  # prev_state only rescales Lambda_bars[0] in the reference -> no effect
    B, L, D = x.shape
    P = packed["vecs"].shape[-1]
    assert P == D, "reference forward requires dim == state_dim (H == P)"

    if block_batch is None:
        # largest divisor of B that is <= 8 while keeping >= 2 grid steps when possible
        cands = [t for t in range(1, min(8, B) + 1)
                 if B % t == 0 and B // t >= min(2, B)]
        block_batch = max(cands)
    tb = block_batch
    if (tb * L) % 8 != 0 and tb != B:
        tb = B                        # keep the row block sublane-aligned or full-extent
    n_rows = tb * L

    x2d = x.reshape(B * L, D)         # wrapper-side layout plumbing (free in XLA)

    kernel = functools.partial(s5block_kernel, seq_len=L,
                               mm_dtype=packed["wproj"].dtype)

    y2d, st = pl.pallas_call(
        kernel,
        out_shape=[
            jax.ShapeDtypeStruct((B * L, D), jnp.float32),
            jax.ShapeDtypeStruct((B, 2, P), jnp.float32),
        ],
        grid_spec=pltpu.PrefetchScalarGridSpec(
            num_scalar_prefetch=0,
            grid=(B // tb,),
            in_specs=[
                pl.BlockSpec((n_rows, D), lambda b: (b, 0)),
                pl.BlockSpec(packed["vecs"].shape, lambda b: (0, 0)),
                pl.BlockSpec(packed["wproj"].shape, lambda b: (0, 0)),
                pl.BlockSpec(packed["wffe"].shape, lambda b: (0, 0)),
                pl.BlockSpec(packed["wdec"].shape, lambda b: (0, 0)),
            ],
            out_specs=[
                pl.BlockSpec((n_rows, D), lambda b: (b, 0)),
                pl.BlockSpec((tb, 2, P), lambda b: (b, 0, 0)),
            ],
        ),
        compiler_params=pltpu.CompilerParams(
            dimension_semantics=("parallel",),
            vmem_limit_bytes=32 * 1024 * 1024,
        ),
    )(x2d, packed["vecs"], packed["wproj"], packed["wffe"], packed["wdec"])

    y = y2d.reshape(B, L, D)
    new_state = jax.lax.complex(st[:, 0, :], st[:, 1, :])
    return y, new_state


def init_params(key, dim, state_dim, ff_mult=1.0, glu=True):
    # Deterministic synthetic init matching the module's parameter shapes.
    assert dim == state_dim, "reference forward requires dim == state_dim"
    assert glu, "this script instantiates the default glu=True block"
    h, p = dim, state_dim
    ff = int(dim * ff_mult)
    k = jax.random.split(key, 6)

    n_out = (h + p) * 2 + 1
    w_xproj = jax.random.normal(k[0], (n_out, h), jnp.float32) / math.sqrt(h)
    w_dtproj = jax.random.uniform(k[1], (h,), jnp.float32, -0.5, 0.5)
    lam_re = -(0.5 + jax.random.uniform(k[2], (p,), jnp.float32, 0.0, 1.0))
    lam_im = math.pi * (jnp.arange(p, dtype=jnp.float32) - p / 2.0) / p
    d_par = jax.random.uniform(k[3], (h,), jnp.float32, 0.0, 1.0)
    w_enc = jax.random.normal(k[4], (2 * ff, dim), jnp.float32) / math.sqrt(dim)
    w_dec = jax.random.normal(k[5], (dim, ff), jnp.float32) / math.sqrt(ff)

    wb = w_xproj[1:1 + 2 * h]                   # rows for B (interleaved re/im)
    wc = w_xproj[1 + 2 * h:1 + 2 * h + 2 * p]   # rows for C (interleaved re/im)

    return dict(
        g1=jnp.ones((1, dim), jnp.float32), b1=jnp.zeros((1, dim), jnp.float32),
        wdt_row=w_xproj[0][None],
        wdtp=w_dtproj[None],
        wbre=wb[0::2].T, wbim=wb[1::2].T,
        wcre=wc[0::2].T, wcim=wc[1::2].T,
        lam_re=lam_re[None], lam_im=lam_im[None],
        dpar=d_par[None],
        g2=jnp.ones((1, dim), jnp.float32), b2=jnp.zeros((1, dim), jnp.float32),
        wenca=w_enc[:ff].T, wencg=w_enc[ff:].T,
        wdec=w_dec.T,
    )


def reference_forward(x, params, matmul_dtype=jnp.float32):
    """Pure-JAX reference (mirrors the PyTorch math) at the kernel's matmul precision."""
    g1, b1 = params["g1"], params["b1"]
    g2, b2 = params["g2"], params["b2"]
    lam = params["lam_re"][0] + 1j * params["lam_im"][0]
    mmdt = matmul_dtype

    def mm(a, w):
        return jnp.dot(a.astype(mmdt), w.astype(mmdt),
                       preferred_element_type=jnp.float32)

    def one(xb):
        fx = _layernorm(xb, g1, b1)
        dt_raw = mm(fx, params["wdt_row"].T)                                  # (L, 1)
        step = jnp.exp(dt_raw * params["wdtp"])
        b_re = mm(fx, params["wbre"]); b_im = mm(fx, params["wbim"])
        c_re = mm(fx, params["wcre"]); c_im = mm(fx, params["wcim"])
        bl = 1.0 / (1.0 - 0.5 * step * lam)
        lbar = bl * (1.0 + 0.5 * step * lam)
        g = bl * step
        bu = g * (b_re * jnp.sum(b_re * fx, -1, keepdims=True)
                  + 1j * b_im * jnp.sum(b_im * fx, -1, keepdims=True))

        def scan_fn(carry, inp):
            a, b = inp
            nxt = b + a * carry
            return nxt, nxt

        _, xs = jax.lax.scan(scan_fn, jnp.zeros_like(bu[0]), (lbar, bu))
        y_ssm = (c_re * jnp.sum(c_re * xs.real, -1, keepdims=True)
                 - c_im * jnp.sum(c_im * xs.imag, -1, keepdims=True)
                 + params["dpar"] * fx)
        x2 = _gelu_exact(y_ssm) + fx
        fx2 = _layernorm(x2, g2, b2)
        a = mm(fx2, params["wenca"])
        gg = mm(fx2, params["wencg"])
        z = a * _gelu_exact(gg)
        out = mm(z, params["wdec"]) + fx2
        return out, xs[-1]

    return jax.vmap(one)(x)


def _check(x, params, packed):
    B, L, dim = x.shape
    states = jnp.zeros((B, dim), jnp.float32)   # S5Block.s5.initial_state(B): real zeros
    y, new_state = s5_block_apply(x, states, packed)
    jax.block_until_ready((y, new_state))
    y_ref, st_ref = reference_forward(x, params, matmul_dtype=packed["wproj"].dtype)
    assert y.shape == (B, L, dim) and new_state.shape == (B, dim)
    assert jnp.allclose(y, y_ref, rtol=1e-2, atol=1e-2), float(jnp.max(jnp.abs(y - y_ref)))
    assert jnp.allclose(new_state, st_ref, rtol=1e-2, atol=1e-2)


if __name__ == "__main__":
    dim = 32
    state_dim = 32

    key = jax.random.PRNGKey(0)
    kx, kx2, kp = jax.random.split(key, 3)
    params = init_params(kp, dim, state_dim)

    # bf16 MXU inputs (f32 accumulation); weights packed & cast once.
    packed = pack_params(params, matmul_dtype=jnp.bfloat16)

    # Case 1: B=2, L=8 -> one sequence per block (tb=1), 2 grid steps (megacore).
    x1 = jax.random.normal(kx, (2, 8, dim), jnp.float32)
    _check(x1, params, packed)

    # Case 2: B=4, L=8 -> two sequences per block (tb=2), exercises the segmented
    # (cross-sequence-blocked) Hillis-Steele scan path.
    x2 = jax.random.normal(kx2, (4, 8, dim), jnp.float32)
    _check(x2, params, packed)

    print("KERNEL_OK")
</pallas_src>

<mosaic_0001>
module attributes {stable_mosaic.version = 11 : i64} {
  func.func @s5block_kernel(%arg0: i32, %arg1: memref<8x32xf32, #tpu.memory_space<vmem>>, %arg2: memref<8x32xf32, #tpu.memory_space<vmem>>, %arg3: memref<32x129xbf16, #tpu.memory_space<vmem>>, %arg4: memref<32x64xbf16, #tpu.memory_space<vmem>>, %arg5: memref<32x32xbf16, #tpu.memory_space<vmem>>, %arg6: memref<8x32xf32, #tpu.memory_space<vmem>>, %arg7: memref<1x2x32xf32, #tpu.memory_space<vmem>>) attributes {dimension_semantics = [#tpu.dimension_semantics<parallel>], iteration_bounds = array<i64: 2>, scalar_prefetch = 0 : i64, scratch_operands = 0 : i64, tpu.core_type = #tpu.core_type<tc>, window_params = [{transform_indices = @transform_0, window_bounds = array<i64: 8, 32>}, {pipeline_mode = #tpu.pipeline_mode<synchronous>, transform_indices = @transform_1, window_bounds = array<i64: 8, 32>}, {pipeline_mode = #tpu.pipeline_mode<synchronous>, transform_indices = @transform_2, window_bounds = array<i64: 32, 129>}, {pipeline_mode = #tpu.pipeline_mode<synchronous>, transform_indices = @transform_3, window_bounds = array<i64: 32, 64>}, {pipeline_mode = #tpu.pipeline_mode<synchronous>, transform_indices = @transform_4, window_bounds = array<i64: 32, 32>}, {transform_indices = @transform_5, window_bounds = array<i64: 8, 32>}, {transform_indices = @transform_6, window_bounds = array<i64: 1, 2, 32>}]} {
    %c0 = arith.constant 0 : index
    %c0_0 = arith.constant 0 : index
    %0 = vector.load %arg1[%c0, %c0_0] : memref<8x32xf32, #tpu.memory_space<vmem>>, vector<8x32xf32>
    %c0_1 = arith.constant 0 : index
    %c0_2 = arith.constant 0 : index
    %1 = vector.load %arg2[%c0_1, %c0_2] : memref<8x32xf32, #tpu.memory_space<vmem>>, vector<8x32xf32>
    %2 = vector.extract_strided_slice %1 {offsets = [0, 0], sizes = [1, 32], strides = [1, 1]} : vector<8x32xf32> to vector<1x32xf32>
    %3 = vector.extract_strided_slice %1 {offsets = [1, 0], sizes = [1, 32], strides = [1, 1]} : vector<8x32xf32> to vector<1x32xf32>
    %4 = vector.extract_strided_slice %1 {offsets = [2, 0], sizes = [1, 32], strides = [1, 1]} : vector<8x32xf32> to vector<1x32xf32>
    %5 = vector.extract_strided_slice %1 {offsets = [3, 0], sizes = [1, 32], strides = [1, 1]} : vector<8x32xf32> to vector<1x32xf32>
    %6 = vector.extract_strided_slice %1 {offsets = [4, 0], sizes = [1, 32], strides = [1, 1]} : vector<8x32xf32> to vector<1x32xf32>
    %7 = vector.extract_strided_slice %1 {offsets = [5, 0], sizes = [1, 32], strides = [1, 1]} : vector<8x32xf32> to vector<1x32xf32>
    %8 = vector.extract_strided_slice %1 {offsets = [6, 0], sizes = [1, 32], strides = [1, 1]} : vector<8x32xf32> to vector<1x32xf32>
    %9 = vector.extract_strided_slice %1 {offsets = [7, 0], sizes = [1, 32], strides = [1, 1]} : vector<8x32xf32> to vector<1x32xf32>
    %cst = arith.constant dense<0.000000e+00> : vector<8xf32>
    %10 = vector.multi_reduction <add>, %0, %cst [1] : vector<8x32xf32> to vector<8xf32>
    %11 = vector.shape_cast %10 : vector<8xf32> to vector<8x1xf32>
    %cst_3 = arith.constant 3.200000e+01 : f32
    %12 = vector.broadcast %cst_3 : f32 to vector<8x1xf32>
    %13 = arith.divf %11, %12 : vector<8x1xf32>
    %14 = vector.broadcast %13 : vector<8x1xf32> to vector<8x32xf32>
    %15 = arith.subf %0, %14 : vector<8x32xf32>
    %16 = arith.mulf %15, %15 : vector<8x32xf32>
    %cst_4 = arith.constant dense<0.000000e+00> : vector<8xf32>
    %17 = vector.multi_reduction <add>, %16, %cst_4 [1] : vector<8x32xf32> to vector<8xf32>
    %18 = vector.shape_cast %17 : vector<8xf32> to vector<8x1xf32>
    %cst_5 = arith.constant 3.200000e+01 : f32
    %19 = vector.broadcast %cst_5 : f32 to vector<8x1xf32>
    %20 = arith.divf %18, %19 : vector<8x1xf32>
    %21 = vector.broadcast %13 : vector<8x1xf32> to vector<8x32xf32>
    %22 = arith.subf %0, %21 : vector<8x32xf32>
    %cst_6 = arith.constant 9.99999974E-6 : f32
    %23 = vector.broadcast %cst_6 : f32 to vector<8x1xf32>
    %24 = arith.addf %20, %23 : vector<8x1xf32>
    %25 = math.rsqrt %24 : vector<8x1xf32>
    %26 = vector.broadcast %25 : vector<8x1xf32> to vector<8x32xf32>
    %27 = arith.mulf %22, %26 : vector<8x32xf32>
    %28 = vector.broadcast %2 : vector<1x32xf32> to vector<8x32xf32>
    %29 = arith.mulf %27, %28 : vector<8x32xf32>
    %30 = vector.broadcast %3 : vector<1x32xf32> to vector<8x32xf32>
    %31 = arith.addf %29, %30 : vector<8x32xf32>
    %32 = arith.truncf %31 : vector<8x32xf32> to vector<8x32xbf16>
    %c0_7 = arith.constant 0 : index
    %c0_8 = arith.constant 0 : index
    %33 = vector.load %arg3[%c0_7, %c0_8] : memref<32x129xbf16, #tpu.memory_space<vmem>>, vector<32x129xbf16>
    %cst_9 = arith.constant dense<0.000000e+00> : vector<8x129xf32>
    %34 = tpu.matmul %32, %33, %cst_9 {dimension_numbers = #tpu.dot_dimension_numbers<[1], [0], [0], [1], [0, 0, 1, 1], [], []>} : vector<8x32xbf16>, vector<32x129xbf16>, vector<8x129xf32> -> vector<8x129xf32>
    %35 = vector.extract_strided_slice %34 {offsets = [0, 0], sizes = [8, 32], strides = [1, 1]} : vector<8x129xf32> to vector<8x32xf32>
    %36 = vector.extract_strided_slice %34 {offsets = [0, 32], sizes = [8, 32], strides = [1, 1]} : vector<8x129xf32> to vector<8x32xf32>
    %37 = vector.extract_strided_slice %34 {offsets = [0, 64], sizes = [8, 32], strides = [1, 1]} : vector<8x129xf32> to vector<8x32xf32>
    %38 = vector.extract_strided_slice %34 {offsets = [0, 96], sizes = [8, 32], strides = [1, 1]} : vector<8x129xf32> to vector<8x32xf32>
    %39 = vector.extract_strided_slice %34 {offsets = [0, 128], sizes = [8, 1], strides = [1, 1]} : vector<8x129xf32> to vector<8x1xf32>
    %40 = vector.broadcast %39 : vector<8x1xf32> to vector<8x32xf32>
    %41 = vector.broadcast %4 : vector<1x32xf32> to vector<8x32xf32>
    %42 = arith.mulf %40, %41 : vector<8x32xf32>
    %43 = math.exp %42 : vector<8x32xf32>
    %cst_10 = arith.constant 5.000000e-01 : f32
    %44 = vector.broadcast %cst_10 : f32 to vector<8x32xf32>
    %45 = arith.mulf %44, %43 : vector<8x32xf32>
    %46 = vector.broadcast %5 : vector<1x32xf32> to vector<8x32xf32>
    %47 = arith.mulf %45, %46 : vector<8x32xf32>
    %48 = vector.broadcast %6 : vector<1x32xf32> to vector<8x32xf32>
    %49 = arith.mulf %45, %48 : vector<8x32xf32>
    %cst_11 = arith.constant 1.000000e+00 : f32
    %50 = vector.broadcast %cst_11 : f32 to vector<8x32xf32>
    %51 = arith.subf %50, %47 : vector<8x32xf32>
    %cst_12 = arith.constant 0.000000e+00 : f32
    %52 = vector.broadcast %cst_12 : f32 to vector<8x32xf32>
    %53 = arith.subf %52, %49 : vector<8x32xf32>
    %54 = arith.mulf %51, %51 : vector<8x32xf32>
    %55 = arith.mulf %53, %53 : vector<8x32xf32>
    %56 = arith.addf %54, %55 : vector<8x32xf32>
    %cst_13 = arith.constant 1.000000e+00 : f32
    %57 = vector.broadcast %cst_13 : f32 to vector<8x32xf32>
    %58 = arith.divf %57, %56 : vector<8x32xf32>
    %59 = arith.mulf %51, %58 : vector<8x32xf32>
    %cst_14 = arith.constant 0.000000e+00 : f32
    %60 = vector.broadcast %cst_14 : f32 to vector<8x32xf32>
    %61 = arith.subf %60, %53 : vector<8x32xf32>
    %62 = arith.mulf %61, %58 : vector<8x32xf32>
    %cst_15 = arith.constant 1.000000e+00 : f32
    %63 = vector.broadcast %cst_15 : f32 to vector<8x32xf32>
    %64 = arith.addf %63, %47 : vector<8x32xf32>
    %65 = arith.mulf %59, %64 : vector<8x32xf32>
    %66 = arith.mulf %62, %49 : vector<8x32xf32>
    %67 = arith.subf %65, %66 : vector<8x32xf32>
    %68 = arith.mulf %59, %49 : vector<8x32xf32>
    %69 = arith.mulf %62, %64 : vector<8x32xf32>
    %70 = arith.addf %68, %69 : vector<8x32xf32>
    %71 = arith.mulf %59, %43 : vector<8x32xf32>
    %72 = arith.mulf %62, %43 : vector<8x32xf32>
    %73 = arith.mulf %35, %31 : vector<8x32xf32>
    %cst_16 = arith.constant dense<0.000000e+00> : vector<8xf32>
    %74 = vector.multi_reduction <add>, %73, %cst_16 [1] : vector<8x32xf32> to vector<8xf32>
    %75 = vector.shape_cast %74 : vector<8xf32> to vector<8x1xf32>
    %76 = arith.mulf %36, %31 : vector<8x32xf32>
    %cst_17 = arith.constant dense<0.000000e+00> : vector<8xf32>
    %77 = vector.multi_reduction <add>, %76, %cst_17 [1] : vector<8x32xf32> to vector<8xf32>
    %78 = vector.shape_cast %77 : vector<8xf32> to vector<8x1xf32>
    %79 = vector.broadcast %75 : vector<8x1xf32> to vector<8x32xf32>
    %80 = arith.mulf %35, %79 : vector<8x32xf32>
    %81 = vector.broadcast %78 : vector<8x1xf32> to vector<8x32xf32>
    %82 = arith.mulf %36, %81 : vector<8x32xf32>
    %83 = arith.mulf %71, %80 : vector<8x32xf32>
    %84 = arith.mulf %72, %82 : vector<8x32xf32>
    %85 = arith.subf %83, %84 : vector<8x32xf32>
    %86 = arith.mulf %71, %82 : vector<8x32xf32>
    %87 = arith.mulf %72, %80 : vector<8x32xf32>
    %88 = arith.addf %86, %87 : vector<8x32xf32>
    %89 = tpu.iota {dimensions = array<i32: 0>} : vector<8x1xi32>
    %c0_i32 = arith.constant 0 : i32
    %90 = vector.broadcast %c0_i32 : i32 to vector<8x1xi32>
    %91 = arith.cmpi eq, %89, %90 : vector<8x1xi32>
    %cst_18 = arith.constant 0.000000e+00 : f32
    %92 = vector.shape_cast %91 : vector<8x1xi1> to vector<8x1xi1>
    %93 = vector.broadcast %92 : vector<8x1xi1> to vector<8x32xi1>
    %94 = vector.broadcast %cst_18 : f32 to vector<8x32xf32>
    %95 = arith.select %93, %94, %67 : vector<8x32xi1>, vector<8x32xf32>
    %cst_19 = arith.constant 0.000000e+00 : f32
    %96 = vector.shape_cast %91 : vector<8x1xi1> to vector<8x1xi1>
    %97 = vector.broadcast %96 : vector<8x1xi1> to vector<8x32xi1>
    %98 = vector.broadcast %cst_19 : f32 to vector<8x32xf32>
    %99 = arith.select %97, %98, %70 : vector<8x32xi1>, vector<8x32xf32>
    %c1_i32 = arith.constant 1 : i32
    %100 = tpu.dynamic_rotate %95 by %c1_i32 dim 0 : vector<8x32xf32>, i32 -> vector<8x32xf32>
    %c1_i32_20 = arith.constant 1 : i32
    %101 = tpu.dynamic_rotate %99 by %c1_i32_20 dim 0 : vector<8x32xf32>, i32 -> vector<8x32xf32>
    %c1_i32_21 = arith.constant 1 : i32
    %102 = tpu.dynamic_rotate %85 by %c1_i32_21 dim 0 : vector<8x32xf32>, i32 -> vector<8x32xf32>
    %c1_i32_22 = arith.constant 1 : i32
    %103 = tpu.dynamic_rotate %88 by %c1_i32_22 dim 0 : vector<8x32xf32>, i32 -> vector<8x32xf32>
    %104 = arith.mulf %95, %102 : vector<8x32xf32>
    %105 = arith.addf %85, %104 : vector<8x32xf32>
    %106 = arith.mulf %99, %103 : vector<8x32xf32>
    %107 = arith.subf %105, %106 : vector<8x32xf32>
    %108 = arith.mulf %95, %103 : vector<8x32xf32>
    %109 = arith.addf %88, %108 : vector<8x32xf32>
    %110 = arith.mulf %99, %102 : vector<8x32xf32>
    %111 = arith.addf %109, %110 : vector<8x32xf32>
    %112 = arith.mulf %95, %100 : vector<8x32xf32>
    %113 = arith.mulf %99, %101 : vector<8x32xf32>
    %114 = arith.subf %112, %113 : vector<8x32xf32>
    %115 = arith.mulf %95, %101 : vector<8x32xf32>
    %116 = arith.mulf %99, %100 : vector<8x32xf32>
    %117 = arith.addf %115, %116 : vector<8x32xf32>
    %c2_i32 = arith.constant 2 : i32
    %118 = tpu.dynamic_rotate %114 by %c2_i32 dim 0 : vector<8x32xf32>, i32 -> vector<8x32xf32>
    %c2_i32_23 = arith.constant 2 : i32
    %119 = tpu.dynamic_rotate %117 by %c2_i32_23 dim 0 : vector<8x32xf32>, i32 -> vector<8x32xf32>
    %c2_i32_24 = arith.constant 2 : i32
    %120 = tpu.dynamic_rotate %107 by %c2_i32_24 dim 0 : vector<8x32xf32>, i32 -> vector<8x32xf32>
    %c2_i32_25 = arith.constant 2 : i32
    %121 = tpu.dynamic_rotate %111 by %c2_i32_25 dim 0 : vector<8x32xf32>, i32 -> vector<8x32xf32>
    %122 = arith.mulf %114, %120 : vector<8x32xf32>
    %123 = arith.addf %107, %122 : vector<8x32xf32>
    %124 = arith.mulf %117, %121 : vector<8x32xf32>
    %125 = arith.subf %123, %124 : vector<8x32xf32>
    %126 = arith.mulf %114, %121 : vector<8x32xf32>
    %127 = arith.addf %111, %126 : vector<8x32xf32>
    %128 = arith.mulf %117, %120 : vector<8x32xf32>
    %129 = arith.addf %127, %128 : vector<8x32xf32>
    %130 = arith.mulf %114, %118 : vector<8x32xf32>
    %131 = arith.mulf %117, %119 : vector<8x32xf32>
    %132 = arith.subf %130, %131 : vector<8x32xf32>
    %133 = arith.mulf %114, %119 : vector<8x32xf32>
    %134 = arith.mulf %117, %118 : vector<8x32xf32>
    %135 = arith.addf %133, %134 : vector<8x32xf32>
    %c4_i32 = arith.constant 4 : i32
    %136 = tpu.dynamic_rotate %125 by %c4_i32 dim 0 : vector<8x32xf32>, i32 -> vector<8x32xf32>
    %c4_i32_26 = arith.constant 4 : i32
    %137 = tpu.dynamic_rotate %129 by %c4_i32_26 dim 0 : vector<8x32xf32>, i32 -> vector<8x32xf32>
    %138 = arith.mulf %132, %136 : vector<8x32xf32>
    %139 = arith.addf %125, %138 : vector<8x32xf32>
    %140 = arith.mulf %135, %137 : vector<8x32xf32>
    %141 = arith.subf %139, %140 : vector<8x32xf32>
    %142 = arith.mulf %132, %137 : vector<8x32xf32>
    %143 = arith.addf %129, %142 : vector<8x32xf32>
    %144 = arith.mulf %135, %136 : vector<8x32xf32>
    %145 = arith.addf %143, %144 : vector<8x32xf32>
    %146 = vector.shape_cast %141 : vector<8x32xf32> to vector<1x8x32xf32>
    %147 = vector.shape_cast %145 : vector<8x32xf32> to vector<1x8x32xf32>
    %148 = vector.extract_strided_slice %146 {offsets = [0, 7, 0], sizes = [1, 1, 32], strides = [1, 1, 1]} : vector<1x8x32xf32> to vector<1x1x32xf32>
    %149 = vector.extract_strided_slice %147 {offsets = [0, 7, 0], sizes = [1, 1, 32], strides = [1, 1, 1]} : vector<1x8x32xf32> to vector<1x1x32xf32>
    %150 = tpu.concatenate %148, %149 in 1 : vector<1x1x32xf32>, vector<1x1x32xf32> -> vector<1x2x32xf32>
    %c0_27 = arith.constant 0 : index
    %c0_28 = arith.constant 0 : index
    %c0_29 = arith.constant 0 : index
    %151 = vector.load %arg7[%c0_27, %c0_28, %c0_29] : memref<1x2x32xf32, #tpu.memory_space<vmem>>, vector<1x2x32xf32>
    tpu.vector_store %arg7[%c0_27, %c0_28, %c0_29], %150 {strides = array<i32>} : memref<1x2x32xf32, #tpu.memory_space<vmem>>, vector<1x2x32xf32>,
    %152 = arith.mulf %37, %141 : vector<8x32xf32>
    %cst_30 = arith.constant dense<0.000000e+00> : vector<8xf32>
    %153 = vector.multi_reduction <add>, %152, %cst_30 [1] : vector<8x32xf32> to vector<8xf32>
    %154 = vector.shape_cast %153 : vector<8xf32> to vector<8x1xf32>
    %155 = arith.mulf %38, %145 : vector<8x32xf32>
    %cst_31 = arith.constant dense<0.000000e+00> : vector<8xf32>
    %156 = vector.multi_reduction <add>, %155, %cst_31 [1] : vector<8x32xf32> to vector<8xf32>
    %157 = vector.shape_cast %156 : vector<8xf32> to vector<8x1xf32>
    %158 = vector.broadcast %154 : vector<8x1xf32> to vector<8x32xf32>
    %159 = arith.mulf %37, %158 : vector<8x32xf32>
    %160 = vector.broadcast %157 : vector<8x1xf32> to vector<8x32xf32>
    %161 = arith.mulf %38, %160 : vector<8x32xf32>
    %162 = arith.subf %159, %161 : vector<8x32xf32>
    %163 = vector.broadcast %7 : vector<1x32xf32> to vector<8x32xf32>
    %164 = arith.mulf %163, %31 : vector<8x32xf32>
    %165 = arith.addf %162, %164 : vector<8x32xf32>
    %cst_32 = arith.constant 5.000000e-01 : f32
    %166 = vector.broadcast %cst_32 : f32 to vector<8x32xf32>
    %167 = arith.mulf %166, %165 : vector<8x32xf32>
    %cst_33 = arith.constant 0.707106769 : f32
    %168 = vector.broadcast %cst_33 : f32 to vector<8x32xf32>
    %169 = arith.mulf %165, %168 : vector<8x32xf32>
    %170 = math.erf %169 : vector<8x32xf32>
    %cst_34 = arith.constant 1.000000e+00 : f32
    %171 = vector.broadcast %cst_34 : f32 to vector<8x32xf32>
    %172 = arith.addf %171, %170 : vector<8x32xf32>
    %173 = arith.mulf %167, %172 : vector<8x32xf32>
    %174 = arith.addf %173, %31 : vector<8x32xf32>
    %cst_35 = arith.constant dense<0.000000e+00> : vector<8xf32>
    %175 = vector.multi_reduction <add>, %174, %cst_35 [1] : vector<8x32xf32> to vector<8xf32>
    %176 = vector.shape_cast %175 : vector<8xf32> to vector<8x1xf32>
    %cst_36 = arith.constant 3.200000e+01 : f32
    %177 = vector.broadcast %cst_36 : f32 to vector<8x1xf32>
    %178 = arith.divf %176, %177 : vector<8x1xf32>
    %179 = vector.broadcast %178 : vector<8x1xf32> to vector<8x32xf32>
    %180 = arith.subf %174, %179 : vector<8x32xf32>
    %181 = arith.mulf %180, %180 : vector<8x32xf32>
    %cst_37 = arith.constant dense<0.000000e+00> : vector<8xf32>
    %182 = vector.multi_reduction <add>, %181, %cst_37 [1] : vector<8x32xf32> to vector<8xf32>
    %183 = vector.shape_cast %182 : vector<8xf32> to vector<8x1xf32>
    %cst_38 = arith.constant 3.200000e+01 : f32
    %184 = vector.broadcast %cst_38 : f32 to vector<8x1xf32>
    %185 = arith.divf %183, %184 : vector<8x1xf32>
    %186 = vector.broadcast %178 : vector<8x1xf32> to vector<8x32xf32>
    %187 = arith.subf %174, %186 : vector<8x32xf32>
    %cst_39 = arith.constant 9.99999974E-6 : f32
    %188 = vector.broadcast %cst_39 : f32 to vector<8x1xf32>
    %189 = arith.addf %185, %188 : vector<8x1xf32>
    %190 = math.rsqrt %189 : vector<8x1xf32>
    %191 = vector.broadcast %190 : vector<8x1xf32> to vector<8x32xf32>
    %192 = arith.mulf %187, %191 : vector<8x32xf32>
    %193 = vector.broadcast %8 : vector<1x32xf32> to vector<8x32xf32>
    %194 = arith.mulf %192, %193 : vector<8x32xf32>
    %195 = vector.broadcast %9 : vector<1x32xf32> to vector<8x32xf32>
    %196 = arith.addf %194, %195 : vector<8x32xf32>
    %197 = arith.truncf %196 : vector<8x32xf32> to vector<8x32xbf16>
    %c0_40 = arith.constant 0 : index
    %c0_41 = arith.constant 0 : index
    %198 = vector.load %arg4[%c0_40, %c0_41] : memref<32x64xbf16, #tpu.memory_space<vmem>>, vector<32x64xbf16>
    %cst_42 = arith.constant dense<0.000000e+00> : vector<8x64xf32>
    %199 = tpu.matmul %197, %198, %cst_42 {dimension_numbers = #tpu.dot_dimension_numbers<[1], [0], [0], [1], [0, 0, 1, 1], [], []>} : vector<8x32xbf16>, vector<32x64xbf16>, vector<8x64xf32> -> vector<8x64xf32>
    %200 = vector.extract_strided_slice %199 {offsets = [0, 0], sizes = [8, 32], strides = [1, 1]} : vector<8x64xf32> to vector<8x32xf32>
    %201 = vector.extract_strided_slice %199 {offsets = [0, 32], sizes = [8, 32], strides = [1, 1]} : vector<8x64xf32> to vector<8x32xf32>
    %cst_43 = arith.constant 5.000000e-01 : f32
    %202 = vector.broadcast %cst_43 : f32 to vector<8x32xf32>
    %203 = arith.mulf %202, %201 : vector<8x32xf32>
    %cst_44 = arith.constant 0.707106769 : f32
    %204 = vector.broadcast %cst_44 : f32 to vector<8x32xf32>
    %205 = arith.mulf %201, %204 : vector<8x32xf32>
    %206 = math.erf %205 : vector<8x32xf32>
    %cst_45 = arith.constant 1.000000e+00 : f32
    %207 = vector.broadcast %cst_45 : f32 to vector<8x32xf32>
    %208 = arith.addf %207, %206 : vector<8x32xf32>
    %209 = arith.mulf %203, %208 : vector<8x32xf32>
    %210 = arith.mulf %200, %209 : vector<8x32xf32>
    %211 = arith.truncf %210 : vector<8x32xf32> to vector<8x32xbf16>
    %c0_46 = arith.constant 0 : index
    %c0_47 = arith.constant 0 : index
    %212 = vector.load %arg5[%c0_46, %c0_47] : memref<32x32xbf16, #tpu.memory_space<vmem>>, vector<32x32xbf16>
    %cst_48 = arith.constant dense<0.000000e+00> : vector<8x32xf32>
    %213 = tpu.matmul %211, %212, %cst_48 {dimension_numbers = #tpu.dot_dimension_numbers<[1], [0], [0], [1], [0, 0, 1, 1], [], []>} : vector<8x32xbf16>, vector<32x32xbf16>, vector<8x32xf32> -> vector<8x32xf32>
    %214 = arith.addf %213, %196 : vector<8x32xf32>
    %c0_49 = arith.constant 0 : index
    %c0_50 = arith.constant 0 : index
    %215 = vector.load %arg6[%c0_49, %c0_50] : memref<8x32xf32, #tpu.memory_space<vmem>>, vector<8x32xf32>
    tpu.vector_store %arg6[%c0_49, %c0_50], %214 {strides = array<i32>} : memref<8x32xf32, #tpu.memory_space<vmem>>, vector<8x32xf32>,
    return
  }
  func.func @transform_0(%arg0: i32) -> (i32, i32) {
    %c0_i32 = arith.constant 0 : i32
    %c0_i32_0 = arith.constant 0 : i32
    return %arg0, %c0_i32 : i32, i32
  }
  func.func @transform_1(%arg0: i32) -> (i32, i32) {
    %c0_i32 = arith.constant 0 : i32
    %c0_i32_0 = arith.constant 0 : i32
    %c0_i32_1 = arith.constant 0 : i32
    return %c0_i32, %c0_i32_0 : i32, i32
  }
  func.func @transform_2(%arg0: i32) -> (i32, i32) {
    %c0_i32 = arith.constant 0 : i32
    %c0_i32_0 = arith.constant 0 : i32
    %c0_i32_1 = arith.constant 0 : i32
    return %c0_i32, %c0_i32_0 : i32, i32
  }
  func.func @transform_3(%arg0: i32) -> (i32, i32) {
    %c0_i32 = arith.constant 0 : i32
    %c0_i32_0 = arith.constant 0 : i32
    %c0_i32_1 = arith.constant 0 : i32
    return %c0_i32, %c0_i32_0 : i32, i32
  }
  func.func @transform_4(%arg0: i32) -> (i32, i32) {
    %c0_i32 = arith.constant 0 : i32
    %c0_i32_0 = arith.constant 0 : i32
    %c0_i32_1 = arith.constant 0 : i32
    return %c0_i32, %c0_i32_0 : i32, i32
  }
  func.func @transform_5(%arg0: i32) -> (i32, i32) {
    %c0_i32 = arith.constant 0 : i32
    %c0_i32_0 = arith.constant 0 : i32
    return %arg0, %c0_i32 : i32, i32
  }
  func.func @transform_6(%arg0: i32) -> (i32, i32, i32) {
    %c0_i32 = arith.constant 0 : i32
    %c0_i32_0 = arith.constant 0 : i32
    %c0_i32_1 = arith.constant 0 : i32
    return %arg0, %c0_i32, %c0_i32_0 : i32, i32, i32
  }
}

</mosaic_0001>

<bundles_post_ra>
// kernel: tpu_custom_call.1
= control target key start
LH: loop header
LB: loop body
LE: loop exit
PB: predicated region body
PF: predicated region fallthrough
CT: control target
= control target key end

     0   :  { %12 = vsyncpa [#allocation3], 0  ;;  %s1825_s0 = inlined_call_operand.hbm [shape: f32[16,32], index: 0, kind: input, shape index: {}]   ;;  %s1826_s1 = inlined_call_operand.hbm [shape: f32[8,32], index: 1, kind: input, shape index: {}]   ;;  %s1827_s2 = inlined_call_operand.hbm [shape: bf16[32,129], index: 2, kind: input, shape index: {}]   ;;  %s1828_s3 = inlined_call_operand.hbm [shape: bf16[32,64], index: 3, kind: input, shape index: {}]   ;;  %s1829_s4 = inlined_call_operand.hbm [shape: bf16[32,32], index: 4, kind: input, shape index: {}]   ;;  %s1830_s5 = inlined_call_operand.hbm [shape: f32[16,32], index: 5, kind: output, shape index: {0}]   ;;  %s1831_s6 = inlined_call_operand.hbm [shape: f32[2,2,32], index: 6, kind: output, shape index: {1}]  }
   0x1   :  { %14 = vsyncpa [#allocation3 + $0x1], 0 }
   0x2   :  { %15 = vsyncpa [#allocation6], 0 }
   0x3   :  { %16 = vsyncpa [#allocation9], 0 }
   0x4   :  { %17 = vsyncpa [#allocation4], 0 }
   0x5   :  { %19 = vsyncpa [#allocation4 + $0x1], 0 }
   0x6   :  { %20 = vsyncpa [#allocation13], 0 }
   0x7   :  { %22 = vsyncpa [#allocation13 + $0x1], 0  ;;  %s1445_s21 = smov 0   ;;  %s1447_s22 = smov 0  }
   0x8   :  { %s1449_s23 = smov 0   ;;  %s1451_s24 = smov 0  }
   0x9 LB: > { %s1393_s25 = smov [#allocation5]   ;;  %s1466_s27 = sadd.s32 4294967295, %s1391_s24   ;;  %s1391_s24 = sphi %s1451_s24, %s1855_s24   ;;  %s1387_s23 = sphi %s1449_s23, %s1854_s23   ;;  %s1383_s22 = sphi %s1447_s22, %s1853_s22   ;;  %s1379_s21 = sphi %s1445_s21, %s1852_s21  }
   0xa   : > { %s208_s26 = sshll.u32 %s1393_s25, 4  ;;  %p962_p0 = scmp.ge.s32.totalorder %s1391_s24, 1  ;;  %s209_s26 = int_to_ptr.vmem [resolvable:$true] %s208_s26 }
   0xb   : > { %p1832_p1 = scmp.eq.s32.totalorder %s1466_s27, 0  ;;  %p195_p2 = scmp.lt.s32.totalorder %s1391_s24, 3 }
   0xc   : > { %s1394_s29 = smov [#allocation8]   ;;  %s1395_s8 = smov [#allocation7]  }
   0xd   : > { %p1471_p3 = pnand %p962_p0, %p195_p2  ;;  %s231_s30 = sshll.u32 %s1394_s29, 4  ;;  %s1478_s30 = int_to_ptr.vmem [resolvable:$true] %s231_s30 }
   0xe   : > { %s218_s9 = sshll.u32 %s1395_s8, 4  ;;  %s1143_s12 = scalar_lea.hbm %s1826_s1, 128  ;;  %s1486_s9 = int_to_ptr.vmem [resolvable:$true] %s218_s9 }
   0xf   : > { %s1835_s28 = scalar_select %p1471_p3, 1, 0 }
  0x10   : > { %p1039_p5 = pneg %p1471_p3  ;;  %p1144_p7 = scmp.ne.s32.totalorder %s1826_s1, %s1143_s12 }
  0x11   : > { %p1150_p11 = scmp.lt.u32.totalorder %s1143_s12, %s1826_s1 }
  0x12   : > { %p1482_p6 = pnand %p1039_p5, %p1832_p1 }
  0x14   : > { %p1496_p8 = pneg %p1482_p6 }
  0x16   : > { %p1146_p9 = pnand %p1496_p8, %p1144_p7 }
  0x18   : > { %p1147_p10 = pneg %p1146_p9 }
  0x1a   : > { %p1152_p12 = pnand %p1150_p11, %p1147_p10 }
  0x1c   : > { %1155 = shalt.err (!%p1152_p12)
}
  0x1d   : > { %s1156_s18 = scalar_lea.vmem %s209_s26, 128  ;;  %p1164_p5 = scmp.lt.s32.totalorder %s209_s26, %s209_s26 }
  0x1e   : > { %p1157_p13 = scmp.ne.s32.totalorder %s209_s26, %s1156_s18  ;;  %p1165_p4 = scmp.lt.s32.totalorder %s1156_s18, %s1156_s18 }
  0x20   : > { %p1159_p0 = pnand %p1157_p13, %p1496_p8  ;;  %p1166_p1 = por %p1165_p4, %p1164_p5 }
  0x22   : > { %p1160_p2 = pneg %p1159_p0 }
  0x24   : > { %p1167_p3 = pnand %p1166_p1, %p1160_p2 }
  0x26   : > { %1170 = shalt.err (!%p1167_p3)
}
  0x27   : > { %1042 = dma.hbm_to_vmem [thread:$0]  (!%p1482_p6), %s1826_s1, 128, %s209_s26, [#allocation6]  }
  0x28   : > { %s1171_s8 = scalar_lea.hbm %s1828_s3, 256 }
  0x29   : > { %p1172_p7 = scmp.ne.s32.totalorder %s1828_s3, %s1171_s8  ;;  %p1178_p1 = scmp.lt.u32.totalorder %s1171_s8, %s1828_s3 }
  0x2b   : > { %p1174_p9 = pnand %p1172_p7, %p1496_p8 }
  0x2d   : > { %p1175_p4 = pneg %p1174_p9 }
  0x2f   : > { %p1180_p3 = pnand %p1178_p1, %p1175_p4 }
  0x31   : > { %1183 = shalt.err (!%p1180_p3)
}
  0x32   : > { %s1184_s26 = scalar_lea.vmem %s1478_s30, 256  ;;  %p1192_p13 = scmp.lt.s32.totalorder %s1478_s30, %s1478_s30 }
  0x33   : > { %p1185_p10 = scmp.ne.s32.totalorder %s1478_s30, %s1184_s26  ;;  %p1193_p0 = scmp.lt.s32.totalorder %s1184_s26, %s1184_s26 }
  0x35   : > { %p1187_p11 = pnand %p1185_p10, %p1496_p8  ;;  %p1194_p2 = por %p1193_p0, %p1192_p13 }
  0x37   : > { %p1188_p12 = pneg %p1187_p11 }
  0x39   : > { %p1195_p5 = pnand %p1194_p2, %p1188_p12 }
  0x3b   : > { %1198 = shalt.err (!%p1195_p5)
}
  0x3c   : > { %s1396_s14 = smov 64   ;;  %s1397_s16 = smov 4  }
  0x3d   : > { %1048 = dma.hbm_to_vmem [thread:$0]  (!%p1482_p6), %s1828_s3, 256, %s1478_s30, [#allocation9], %s1396_s14, %s1396_s14, %s1397_s16  }
  0x3e   : > { %s1199_s25 = scalar_lea.hbm %s1827_s2, 512 }
  0x3f   : > { %p1200_p7 = scmp.ne.s32.totalorder %s1827_s2, %s1199_s25  ;;  %p1206_p1 = scmp.lt.u32.totalorder %s1199_s25, %s1827_s2 }
  0x41   : > { %p1202_p9 = pnand %p1200_p7, %p1496_p8 }
  0x43   : > { %p1203_p4 = pneg %p1202_p9 }
  0x45   : > { %p1208_p3 = pnand %p1206_p1, %p1203_p4 }
  0x47   : > { %1211 = shalt.err (!%p1208_p3)
}
  0x48   : > { %s1212_s30 = scalar_lea.vmem %s1486_s9, 512  ;;  %p1220_p13 = scmp.lt.s32.totalorder %s1486_s9, %s1486_s9 }
  0x49   : > { %p1213_p10 = scmp.ne.s32.totalorder %s1486_s9, %s1212_s30  ;;  %p1221_p0 = scmp.lt.s32.totalorder %s1212_s30, %s1212_s30 }
  0x4b   : > { %p1215_p11 = pnand %p1213_p10, %p1496_p8  ;;  %p1222_p2 = por %p1221_p0, %p1220_p13 }
  0x4d   : > { %p1216_p12 = pneg %p1215_p11 }
  0x4f   : > { %p1223_p5 = pnand %p1222_p2, %p1216_p12 }
  0x51   : > { %1226 = shalt.err (!%p1223_p5)
}
  0x52   : > { %s1398_s12 = smov 128   ;;  %s1399_s13 = smov 8  }
  0x53   : > { %1045 = dma.hbm_to_vmem [thread:$0]  (!%p1482_p6), %s1827_s2, 512, %s1486_s9, [#allocation6], %s1398_s12, %s1398_s12, %s1399_s13  }
  0x54   : > { %s1400_s18 = smov [#allocation10]   ;;  %s1227_s29 = scalar_lea.hbm %s1829_s4, 256 }
  0x55   : > { %s244_s19 = sshll.u32 %s1400_s18, 4  ;;  %p1228_p7 = scmp.ne.s32.totalorder %s1829_s4, %s1227_s29  ;;  %s245_s19 = int_to_ptr.vmem [resolvable:$true] %s244_s19 }
  0x56   : > { %p1234_p1 = scmp.lt.u32.totalorder %s1227_s29, %s1829_s4 }
  0x57   : > { %p1230_p9 = pnand %p1228_p7, %p1496_p8 }
  0x59   : > { %p1231_p4 = pneg %p1230_p9 }
  0x5b   : > { %p1236_p3 = pnand %p1234_p1, %p1231_p4 }
  0x5d   : > { %1239 = shalt.err (!%p1236_p3)
}
  0x5e   : > { %s1240_s9 = scalar_lea.vmem %s245_s19, 256  ;;  %p1248_p13 = scmp.lt.s32.totalorder %s245_s19, %s245_s19 }
  0x5f   : > { %p1241_p10 = scmp.ne.s32.totalorder %s245_s19, %s1240_s9  ;;  %p1249_p0 = scmp.lt.s32.totalorder %s1240_s9, %s1240_s9 }
  0x61   : > { %p1243_p11 = pnand %p1241_p10, %p1496_p8  ;;  %p1250_p2 = por %p1249_p0, %p1248_p13 }
  0x63   : > { %p1244_p12 = pneg %p1243_p11 }
  0x65   : > { %p1251_p5 = pnand %p1250_p2, %p1244_p12 }
  0x67   : > { %1254 = shalt.err (!%p1251_p5)
}
  0x68   : > { %1051 = dma.hbm_to_vmem [thread:$0]  (!%p1482_p6), %s1829_s4, 256, %s245_s19, [#allocation9], %s1396_s14, %s1396_s14, %s1397_s16  }
  0x69   : > { %s961_s7 = sadd.s32 4294967294, %s1391_s24   ;;  %s1584_s15 = sadd.s32 1, %s1391_s24  }
  0x6a   : > { %s32_s26 = ssub.s32 %s1391_s24, %s1584_s15  ;;  %s35_s17 = sadd.s32 1, %s1387_s23 }
  0x6b   : > { %p33_p8 = scmp.eq.s32.totalorder %s32_s26, 0  ;;  %p42_p7 = scmp.ne.s32.totalorder %s1387_s23, %s1383_s22 }
  0x6c   : > { %p43_p9 = scmp.eq.s32.totalorder %s1391_s24, 0  ;;  %p48_p4 = scmp.ne.s32.totalorder %s1383_s22, %s1379_s21 }
  0x6d   : > { %s1595_s18 = scalar_select %p33_p8, %s1387_s23, %s35_s17  }
  0x6e   : > { %p1597_p1 = por %p43_p9, %p42_p7  ;;  %p1839_p3 = scmp.eq.s32.totalorder %s1466_s27, 0 }
  0x6f   : > { %p156_p10 = scmp.eq.s32.totalorder %s1466_s27, 1  ;;  %p162_p11 = scmp.eq.s32.totalorder %s961_s7, 1 }
  0x70   : > { %p1603_p6 = por %p1839_p3, %p48_p4  ;;  %p1067_p12 = scmp.lt.s32.totalorder %s1391_s24, 2 }
  0x71   : > { %s258_s16 = sand.u32 1, %s1387_s23   ;;  %p1610_p13 = por %p156_p10, %p42_p7 }
  0x72   : > { %p1614_p0 = por %p162_p11, %p48_p4  ;;  %s968_s29 = sshll.u32 %s258_s16, 3 }
  0x73   : > { %s1841_s19 = scalar_select %p1610_p13, 1, 0 }
  0x74   : > { %s1842_s25 = scalar_select %p1614_p0, 1, 0 }
  0x75   : > { %s969_s8 = sshll.u32 %s1391_s24, 7  ;;  %s262_s9 = scalar_lea.vmem [#allocation2], %s968_s29 }
  0x76   : > { %s1622_s30 = scalar_lea.hbm %s1825_s0, %s969_s8  ;;  %s269_s12 = sshll.u32 %s262_s9, 4  ;;  %s1624_s12 = int_to_ptr.vmem [resolvable:$true] %s269_s12 }
  0x77   : > { %p1628_p2 = pnand %p1067_p12, %p1597_p1  ;;  %s259_s7 = scalar_lea.sflag [#allocation3], %s258_s16 }
  0x78   : > { %s1255_s26 = scalar_lea.hbm %s1622_s30, 128  ;;  %s1260_s8 = scalar_lea.hbm %s1825_s0, 256 }
  0x79   : > { %p1256_p5 = scmp.ne.s32.totalorder %s1622_s30, %s1255_s26  ;;  %p1257_p8 = pneg %p1628_p2 }
  0x7a   : > { %p1261_p4 = scmp.lt.u32.totalorder %s1622_s30, %s1825_s0  ;;  %p1262_p1 = scmp.lt.u32.totalorder %s1260_s8, %s1255_s26 }
  0x7b   : > { %p1258_p7 = pnand %p1257_p8, %p1256_p5  ;;  %p1264_p10 = scmp.lt.u32.totalorder %s1255_s26, %s1622_s30 }
  0x7c   : > { %p1263_p3 = por %p1262_p1, %p1261_p4 }
  0x7d   : > { %p1259_p9 = pneg %p1258_p7 }
  0x7e   : > { %p1265_p11 = por %p1264_p10, %p1263_p3 }
  0x80   : > { %p1266_p12 = pnand %p1265_p11, %p1259_p9 }
  0x82   : > { %1269 = shalt.err (!%p1266_p12)
}
  0x83   : > { %s1270_s16 = scalar_lea.vmem %s1624_s12, 128  ;;  %s1401_s11 = smov [#allocation2]  }
  0x84   : > { %p1271_p5 = scmp.ne.s32.totalorder %s1624_s12, %s1270_s16  ;;  %s1275_s9 = sshll.u32 %s1401_s11, 4  ;;  %s1276_s9 = int_to_ptr.vmem [resolvable:$false] %s1275_s9 }
  0x85   : > { %s1277_s17 = scalar_lea.vmem %s1276_s9, 256  ;;  %p1278_p13 = scmp.lt.s32.totalorder %s1624_s12, %s1276_s9 }
  0x86   : > { %p1273_p7 = pnand %p1271_p5, %p1257_p8  ;;  %p1279_p4 = scmp.lt.s32.totalorder %s1277_s17, %s1270_s16 }
  0x88   : > { %p1274_p0 = pneg %p1273_p7  ;;  %p1280_p1 = por %p1279_p4, %p1278_p13 }
  0x8a   : > { %p1281_p3 = pnand %p1280_p1, %p1274_p0 }
  0x8c   : > { %1284 = shalt.err (!%p1281_p3)
}
  0x8d   : > { %1055 = dma.hbm_to_vmem [thread:$0]  (!%p1628_p2), %s1622_s30, 128, %s1624_s12, %s259_s7  }
  0x8e   : > { %p1844_p9 = scmp.ne.s32.totalorder %s1835_s28, 0 }
  0x8f   : > { %s1660_s26 = sand.u32 (!%p1844_p9), 1, %s1383_s22  }
  0x90   : > { %278 = sbr.rel (%p1844_p9) target bundleno = 2843 (0xb1b), region = 40  ;;  %s971_s29 = sshll.u32 (!%p1844_p9), %s1660_s26, 3 }
  0x91   : > { %s281_s8 = scalar_lea.sflag (!%p1844_p9), [#allocation3], %s1660_s26  ;;  %s284_s20 = scalar_lea.vmem (!%p1844_p9), [#allocation2], %s971_s29 }
  0x97   : > { %1358 = dma.done.wait (%p1603_p6), %s281_s8, 128  }
  0x98   : > { %1360 = vsyncadd (%p1603_p6), %s281_s8, 4294967168  ;;  %p1845_p13 = scmp.eq.s32.totalorder %s1466_s27, 0 }
  0x9a   : > { %1362 = dma.done.wait (%p1845_p13), [#allocation6], 640   ;;  %p1846_p0 = pmov %p1845_p13 }
  0x9c   : > { %1364 = vsyncadd (%p1846_p0), [#allocation6], 4294966656  ;;  %p1847_p2 = pmov %p1846_p0 }
  0x9d   : > { %p1848_p8 = pmov %p1846_p0 }
  0x9e   : > { %1366 = dma.done.wait (%p1847_p2), [#allocation9], 512  }
  0x9f   : > { %1368 = vsyncadd (%p1848_p8), [#allocation9], 4294966784  ;;  %vm337_vm0 = vcmask 261120   ;;  %v335_v0 = vld [vmem:[%s284_s20] sm:$0xff]  ;;  %v1402_v11 = vmov 0   ;;  %v352_v14 = vlaneseq  ;;  %v1683_v18 = vld [vmem:[#allocation5] sm:$0xff] }
  0xa0   : > { %v338_v1 = vsel %vm337_vm0, %v335_v0, 0.0  ;;  %v1121_v7 = vld [vmem:[#allocation7 + $0x4] ss:$8 sps:$4 sm:$0xff]   ;;  %v1123_v8 = vld [vmem:[#allocation7] ss:$8 sps:$4 sm:$0xff]   ;;  %422 = vmatprep.mubr.bf16.mxu0 %v1402_v11  ;;  %1119 = vset.pattern.permute.xlu1 %v1402_v11  ;;  %s1403_s28 = smov 32  }
  0xa1   : > { %339 = vadd.xlane.f32.xlu0 %v338_v1  ;;  %390 = vmatprep.subr.bf16.mxu0 %v1121_v7  ;;  %v1124_v9 = vld [vmem:[#allocation7 + $0x14] ss:$8 sps:$4 sm:$0xff]   ;;  %v1126_v10 = vld [vmem:[#allocation7 + $0x10] ss:$8 sps:$4 sm:$0xff]   ;;  %v1680_v16 = vshrl.u32 %v352_v14, 7  ;;  %s1404_s14 = smov 96  }
  0xa2   : > { %391 = vmatpush1.bf16.msra.mxu0 %v1123_v8  ;;  %1120 = vset.pattern.permute.xlu0 %v1402_v11  ;;  %s977_s30 = sshll.u32 %s1660_s26, 1  ;;  %vm560_vm2 = vcmask 1040384   ;;  %s1405_s12 = smov 64   ;;  %vm562_vm3 = vcmask 254976   ;;  %vm1407_vm4 = vmmov 0  }
  0xa3   : > { %392 = vmatprep.subr.bf16.mxu0 %v1124_v9  ;;  %v354_v17 = vsub.s32 0, %v1680_v16  ;;  %v359_v19 = vsub.s32 1, %v1680_v16  ;;  %v438_v39 = vsub.s32 2, %v1680_v16  ;;  %v446_v44 = vsub.s32 3, %v1680_v16  ;;  %s1716_s13 = scalar_lea.vmem [#allocation12], %s977_s30  ;;  %s992_s7 = sshll.u32 %s1466_s27, 5 }
  0xa4   : > { %v451_v45 = vsub.s32 4, %v1680_v16  ;;  %vm503_vm1 = vcmp.eq.s32.totalorder %v1680_v16, 0  ;;  %s821_s10 = sshll.u32 %s1716_s13, 4  ;;  %s1754_s9 = scalar_lea.hbm %s1831_s6, %s992_s7  ;;  %s822_s10 = int_to_ptr.vmem [resolvable:$true] %s821_s10 }
  0xa5   : > { %v355_v20 = vrot.slane %v1683_v18, %v354_v17  ;;  %v360_v23 = vrot.slane %v1683_v18, %v359_v19  ;;  %v439_v40 = vrot.slane %v1683_v18, %v438_v39  ;;  %v447_v47 = vrot.slane %v1683_v18, %v446_v44  ;;  %s795_s17 = scalar_lea.sflag [#allocation13], %s1660_s26  ;;  %s1285_s8 = scalar_lea.vmem %s822_s10, 32 }
  0xa6   : > { %393 = vmatpush1.bf16.msra.mxu0 %v1126_v10  ;;  %v452_v48 = vrot.slane %v1683_v18, %v451_v45  ;;  %p1286_p6 = scmp.ne.s32.totalorder %s822_s10, %s1285_s8  ;;  %p1849_p10 = scmp.ne.s32.totalorder %s1841_s19, 0 }
  0xa7   : > { %s1408_s20 = smov [#allocation12]  }
  0xa8   : > { %p1287_p11 = pnand %p1286_p6, %p1849_p10 }
  0xaa   : > { %p1288_p12 = pneg %p1287_p11 }
 0x12e   : > { %v340_v2 = vpop.xlane.xlu0 %339 }
 0x12f   : > { %v342_v3 = vmul.f32 0.03125, %v340_v2 }
 0x131   : > { %v343_v4 = vsub.f32 %v335_v0, %v342_v3 }
 0x133   : > { %v344_v5 = vmul.f32 %v343_v4, %v343_v4 }
 0x135   : > { %v345_v6 = vsel %vm337_vm0, %v344_v5, 0.0 }
 0x136   : > { %346 = vadd.xlane.f32.xlu0 %v345_v6 }
 0x1c3   : > { %v347_v12 = vpop.xlane.xlu0 %346 }
 0x1c4   : > { %v348_v13 = vmul.f32 0.03125, %v347_v12 }
 0x1c6   : > { %v349_v15 = vadd.f32 1e-05, %v348_v13 }
 0x1c8   : > { %1131 = vrsqrt.f32 %v349_v15 }
 0x1d2   : > { %v1132_v21 = vpop.eup %1131 }
 0x1d3   : > { %v351_v22 = vmul.f32 %v1132_v21, %v343_v4 }
 0x1d5   : > { %v356_v24 = vmul.f32 %v355_v20, %v351_v22 }
 0x1d7   : > { %v1688_v25 = vadd.f32 %v360_v23, %v356_v24 }
 0x1d9   : > { %478 = vrot.lane.b32.xlu1 %v1688_v25, %s1403_s28  ;;  %v362_v26 = vpack.c.bf16 %v1688_v25, %v1688_v25 }
 0x1db   : > { %982 = vmatmul.mubr.msk.bf16.vlgmr.msra.gmra.mrb[0].mxu0 %vm337_vm0, %v362_v26 }
 0x24b   : > { %v479_v27 = vpop.permute.xlu1 %478 }
 0x2ae   : > { %v1695_v28 = vpop.f32.mrb[0].mxu0 }
 0x2af   : > { %v426_v29 = vpop.f32.mrb[1].mxu0  ;;  %v481_v30 = vmul.f32 %v479_v27, %v1695_v28  ;;  %v473_v35 = vmul.f32 %v1695_v28, %v1688_v25 }
 0x2b0   : > { %v428_v31 = vpop.f32.mrb[2].mxu0 }
 0x2b1   : > { %483 = vrot.lane.b32.xlu1 %v481_v30, %s1404_s14  ;;  %v429_v32 = vpop.f32.mrb[3].mxu0  ;;  %v474_v36 = vsel %vm337_vm0, %v473_v35, 0.0 }
 0x2b5   : > { %433 = vperm.xlu1 %1119, %v426_v29  }
 0x323   : > { %v484_v33 = vpop.permute.xlu1 %483 }
 0x324   : > { %v486_v34 = vsel %vm337_vm0, %v484_v33, 0.0 }
 0x325   : > { %487 = vadd.xlane.f32.xlu0 %v486_v34 }
 0x329   : > { %475 = vadd.xlane.f32.xlu0 %v474_v36 }
 0x334   : > { %v434_v41 = vpop.permute.xlu1 %433 }
 0x335   : > { %v440_v42 = vmul.f32 %v439_v40, %v434_v41 }
 0x337   : > { %v441_v43 = vmul.f32 1.442695, %v440_v42 }
 0x339   : > { %1133 = vpow2.f32 %v441_v43 }
 0x343   : > { %v1134_v46 = vpop.eup %1133 }
 0x344   : > { %v443_v49 = vmul.f32 0.5, %v1134_v46 }
 0x346   : > { %v448_v50 = vmul.f32 %v447_v47, %v443_v49  ;;  %v453_v51 = vmul.f32 %v452_v48, %v443_v49 }
 0x348   : > { %v454_v52 = vsub.f32 1.0, %v448_v50  ;;  %v455_v53 = vsub.f32 0.0, %v453_v51  ;;  %v464_v61 = vadd.f32 1.0, %v448_v50 }
 0x34a   : > { %v456_v54 = vmul.f32 %v454_v52, %v454_v52  ;;  %v457_v55 = vmul.f32 %v455_v53, %v455_v53  ;;  %v462_v58 = vsub.f32 0.0, %v455_v53 }
 0x34c   : > { %v458_v56 = vadd.f32 %v457_v55, %v456_v54 }
 0x34e   : > { %1135 = vrcp.f32 %v458_v56 }
 0x358   : > { %v1136_v57 = vpop.eup %1135 }
 0x359   : > { %v461_v59 = vmul.f32 %v1136_v57, %v454_v52  ;;  %v463_v60 = vmul.f32 %v1136_v57, %v462_v58 }
 0x35b   : > { %v465_v62 = vmul.f32 %v464_v61, %v461_v59  ;;  %v466_v63 = vmul.f32 %v463_v60, %v453_v51  ;;  %v468_v0 = vmul.f32 %v461_v59, %v453_v51  ;;  %v469_v1 = vmul.f32 %v464_v61, %v463_v60 }
 0x35c   : > { %v471_v8 = vmul.f32 %v1134_v46, %v461_v59  ;;  %v472_v9 = vmul.f32 %v1134_v46, %v463_v60 }
 0x35d   : > { %v467_v2 = vsub.f32 %v465_v62, %v466_v63  ;;  %v470_v3 = vadd.f32 %v469_v1, %v468_v0 }
 0x35f   : > { %v506_v6 = vsel %vm503_vm1, 0.0, %v467_v2  ;;  %v507_v7 = vsel %vm503_vm1, 0.0, %v470_v3 }
 0x360   : > { %v508_v10 = vrot.slane %v506_v6, 7  ;;  %v509_v11 = vrot.slane %v507_v7, 7 }
 0x362   : > { %v520_v21 = vmul.f32 %v508_v10, %v506_v6  ;;  %v521_v22 = vmul.f32 %v509_v11, %v507_v7  ;;  %v523_v23 = vmul.f32 %v509_v11, %v506_v6  ;;  %v524_v24 = vmul.f32 %v508_v10, %v507_v7 }
 0x364   : > { %v522_v31 = vsub.f32 %v520_v21, %v521_v22  ;;  %v525_v32 = vadd.f32 %v524_v24, %v523_v23 }
 0x366   : > { %v526_v39 = vrot.slane %v522_v31, 6  ;;  %v527_v40 = vrot.slane %v525_v32, 6 }
 0x368   : > { %v538_v45 = vmul.f32 %v526_v39, %v522_v31  ;;  %v539_v46 = vmul.f32 %v527_v40, %v525_v32  ;;  %v541_v53 = vmul.f32 %v527_v40, %v522_v31  ;;  %v542_v54 = vmul.f32 %v526_v39, %v525_v32 }
 0x36a   : > { %v540_v55 = vsub.f32 %v538_v45, %v539_v46  ;;  %v543_v58 = vadd.f32 %v542_v54, %v541_v53  ;;  %v1127_v46 = vld [vmem:[#allocation8] sm:$0xff]  }
 0x3b2   : > { %v488_v37 = vpop.xlane.xlu0 %487 }
 0x3b3   : > { %v490_v38 = vmul.f32 %v488_v37, %v1695_v28 }
 0x3b5   : > { %493 = vrot.lane.b32.xlu1 %v490_v38, %s1404_s14 }
 0x3b6   : > { %v476_v4 = vpop.xlane.xlu0 %475 }
 0x3b7   : > { %v489_v5 = vmul.f32 %v476_v4, %v1695_v28 }
 0x3b9   : > { %v491_v13 = vmul.f32 %v489_v5, %v471_v8  ;;  %v499_v14 = vmul.f32 %v489_v5, %v472_v9 }
 0x427   : > { %v494_v12 = vpop.permute.xlu1 %493 }
 0x428   : > { %v496_v15 = vmul.f32 %v494_v12, %v472_v9  ;;  %v498_v17 = vmul.f32 %v494_v12, %v471_v8 }
 0x42a   : > { %v497_v19 = vsub.f32 %v491_v13, %v496_v15  ;;  %v500_v20 = vadd.f32 %v499_v14, %v498_v17  ;;  %v595_v14 = vsub.s32 5, %v1680_v16 }
 0x42c   : > { %v510_v26 = vrot.slane %v497_v19, 7  ;;  %v511_v27 = vrot.slane %v500_v20, 7  ;;  %v596_v15 = vrot.slane %v1683_v18, %v595_v14 }
 0x42e   : > { %v512_v29 = vmul.f32 %v510_v26, %v506_v6  ;;  %v516_v30 = vmul.f32 %v511_v27, %v506_v6  ;;  %v514_v34 = vmul.f32 %v511_v27, %v507_v7  ;;  %v518_v36 = vmul.f32 %v510_v26, %v507_v7 }
 0x42f   : > { %v597_v17 = vmul.f32 %v596_v15, %v1688_v25 }
 0x430   : > { %v513_v33 = vadd.f32 %v512_v29, %v497_v19  ;;  %v517_v35 = vadd.f32 %v516_v30, %v500_v20 }
 0x432   : > { %v515_v37 = vsub.f32 %v513_v33, %v514_v34  ;;  %v519_v38 = vadd.f32 %v518_v36, %v517_v35 }
 0x434   : > { %v528_v41 = vrot.slane %v515_v37, 6  ;;  %v529_v42 = vrot.slane %v519_v38, 6 }
 0x436   : > { %v530_v43 = vmul.f32 %v528_v41, %v522_v31  ;;  %v534_v44 = vmul.f32 %v529_v42, %v522_v31  ;;  %v532_v48 = vmul.f32 %v529_v42, %v525_v32  ;;  %v536_v50 = vmul.f32 %v528_v41, %v525_v32 }
 0x438   : > { %v531_v47 = vadd.f32 %v530_v43, %v515_v37  ;;  %v535_v49 = vadd.f32 %v534_v44, %v519_v38  ;;  %v644_v44 = vsub.s32 7, %v1680_v16 }
 0x43a   : > { %v533_v51 = vsub.f32 %v531_v47, %v532_v48  ;;  %v537_v52 = vadd.f32 %v536_v50, %v535_v49  ;;  %v645_v45 = vrot.slane %v1683_v18, %v644_v44  ;;  %v1406_v47 = vmov 0.0   ;;  %v1128_v48 = vld [vmem:[#allocation8 + $0x8] sm:$0xff]  }
 0x43b   : > { %1001 = vmatprep.subr.bf16.mxu1 %v1406_v47  ;;  %1009 = vmatprep.subr.bf16.mxu0 %v1406_v47 }
 0x43c   : > { %v544_v56 = vrot.slane %v533_v51, 4  ;;  %v545_v57 = vrot.slane %v537_v52, 4  ;;  %1002 = vmatpush3.bf16.msra.mxu1 %v1127_v46  ;;  %1005 = vmatprep.mubr.msk.bf16.mxu1 %vm1407_vm4, %v1406_v47 }
 0x43d   : > { %1003 = vmatprep.subr.bf16.mxu1 %v1406_v47  ;;  %1013 = vmatprep.mubr.msk.bf16.mxu0 %vm1407_vm4, %v1406_v47 }
 0x43e   : > { %v550_v59 = vmul.f32 %v545_v57, %v540_v55  ;;  %v546_v60 = vmul.f32 %v544_v56, %v540_v55  ;;  %v552_v62 = vmul.f32 %v544_v56, %v543_v58  ;;  %v548_v0 = vmul.f32 %v545_v57, %v543_v58  ;;  %v1129_v58 = vld [vmem:[#allocation10] sm:$0xff]  }
 0x43f   : > { %1010 = vmatpush3.bf16.msra.mxu0 %v1129_v58 }
 0x440   : > { %v551_v61 = vadd.f32 %v550_v59, %v537_v52  ;;  %v547_v63 = vadd.f32 %v546_v60, %v533_v51  ;;  %1004 = vmatpush3.bf16.msra.mxu1 %v1128_v48  ;;  %1011 = vmatprep.subr.bf16.mxu0 %v1406_v47 }
 0x442   : > { %v553_v1 = vadd.f32 %v552_v62, %v551_v61  ;;  %v549_v2 = vsub.f32 %v547_v63, %v548_v0  ;;  %v1130_v0 = vld [vmem:[#allocation10 + $0x8] sm:$0xff]  }
 0x443   : > { %1012 = vmatpush3.bf16.msra.mxu0 %v1130_v0 }
 0x444   : > { %575 = vrot.lane.b32.xlu0 %v553_v1, %s1404_s14  ;;  %v558_v3 = vrot.slane %v553_v1, 6  ;;  %564 = vrot.lane.b32.xlu1 %v549_v2, %s1405_s12  ;;  %v555_v4 = vrot.slane %v549_v2, 7 }
 0x446   : > { %v561_v5 = vsel %vm560_vm2, %v555_v4, %v558_v3 }
 0x447   : > { %563 = vst.msk [vmem:[%s1716_s13] sm:$0x3] %vm562_vm3, %v561_v5 }
 0x4b6   : > { %v576_v6 = vpop.permute.xlu0 %575  ;;  %v565_v8 = vpop.permute.xlu1 %564 }
 0x4b7   : > { %v578_v7 = vmul.f32 %v576_v6, %v1695_v28  ;;  %v567_v9 = vmul.f32 %v565_v8, %v1695_v28 }
 0x4b9   : > { %580 = vrot.lane.b32.xlu1 %v578_v7, %s1403_s28  ;;  %s1289_s28 = sshll.u32 %s1408_s20, 4  ;;  %s1290_s28 = int_to_ptr.vmem [resolvable:$false] %s1289_s28 }
 0x4ba   : > { %p1292_p5 = scmp.lt.s32.totalorder %s822_s10, %s1290_s28 }
 0x4bd   : > { %569 = vrot.lane.b32.xlu1 %v567_v9, %s1405_s12 }
 0x52b   : > { %v581_v10 = vpop.permute.xlu1 %580 }
 0x52c   : > { %v583_v11 = vsel %vm337_vm0, %v581_v10, 0.0 }
 0x52d   : > { %584 = vadd.xlane.f32.xlu1 %v583_v11 }
 0x52f   : > { %v570_v12 = vpop.permute.xlu1 %569 }
 0x530   : > { %v572_v13 = vsel %vm337_vm0, %v570_v12, 0.0 }
 0x531   : > { %573 = vadd.xlane.f32.xlu0 %v572_v13 }
 0x547   : > { %599 = vrot.lane.b32.xlu0 %v597_v17, %s1405_s12 }
 0x5ba   : > { %v585_v19 = vpop.xlane.xlu1 %584 }
 0x5bb   : > { %v587_v20 = vmul.f32 %v585_v19, %v1695_v28 }
 0x5bd   : > { %589 = vrot.lane.b32.xlu1 %v587_v20, %s1404_s14 }
 0x5be   : > { %v574_v21 = vpop.xlane.xlu0 %573 }
 0x5bf   : > { %v586_v22 = vmul.f32 %v574_v21, %v1695_v28  ;;  %v635_v28 = vsub.s32 6, %v1680_v16 }
 0x5c1   : > { %608 = vrot.lane.b32.xlu1 %v1688_v25, %s1405_s12  ;;  %v636_v37 = vrot.slane %v1683_v18, %v635_v28 }
 0x5c2   : > { %v600_v26 = vpop.permute.xlu0 %599 }
 0x62f   : > { %v590_v23 = vpop.permute.xlu1 %589 }
 0x630   : > { %v592_v24 = vsub.f32 %v586_v22, %v590_v23 }
 0x632   : > { %v602_v27 = vadd.f32 %v600_v26, %v592_v24 }
 0x633   : > { %v609_v34 = vpop.permute.xlu1 %608 }
 0x634   : > { %v604_v29 = vmul.f32 0.70710677, %v602_v27  ;;  %v603_v31 = vmul.f32 0.5, %v602_v27 }
 0x636   : > { %1137 = verf.f32 %v604_v29 }
 0x640   : > { %v1138_v30 = vpop.eup %1137 }
 0x641   : > { %v606_v32 = vadd.f32 1.0, %v1138_v30 }
 0x643   : > { %v607_v33 = vmul.f32 %v606_v32, %v603_v31 }
 0x645   : > { %v611_v35 = vadd.f32 %v609_v34, %v607_v33 }
 0x647   : > { %613 = vrot.lane.b32.xlu1 %v611_v35, %s1405_s12 }
 0x6b9   : > { %v614_v36 = vpop.permute.xlu1 %613 }
 0x6ba   : > { %v616_v25 = vsel %vm337_vm0, %v614_v36, 0.0 }
 0x6bb   : > { %617 = vadd.xlane.f32.xlu1 %v616_v25 }
 0x6cc   : > { %638 = vrot.lane.b32.xlu1 %v636_v37, %s1405_s12 }
 0x748   : > { %v618_v38 = vpop.xlane.xlu1 %617 }
 0x749   : > { %v619_v39 = vmul.f32 0.03125, %v618_v38 }
 0x74b   : > { %v620_v40 = vsub.f32 %v611_v35, %v619_v39 }
 0x74c   : > { %v639_v52 = vpop.permute.xlu1 %638 }
 0x74d   : > { %v621_v41 = vmul.f32 %v620_v40, %v620_v40 }
 0x74f   : > { %623 = vrot.lane.b32.xlu0 %v621_v41, %s1405_s12 }
 0x7c1   : > { %v624_v42 = vpop.permute.xlu0 %623 }
 0x7c2   : > { %v626_v43 = vsel %vm337_vm0, %v624_v42, 0.0 }
 0x7c3   : > { %627 = vadd.xlane.f32.xlu0 %v626_v43 }
 0x7d9   : > { %647 = vrot.lane.b32.xlu0 %v645_v45, %s1405_s12 }
 0x850   : > { %v628_v49 = vpop.xlane.xlu0 %627 }
 0x851   : > { %v629_v50 = vmul.f32 0.03125, %v628_v49 }
 0x853   : > { %v630_v51 = vadd.f32 1e-05, %v629_v50 }
 0x854   : > { %v648_v53 = vpop.permute.xlu0 %647 }
 0x855   : > { %1139 = vrsqrt.f32 %v630_v51 }
 0x85f   : > { %v1140_v16 = vpop.eup %1139 }
 0x860   : > { %v632_v18 = vmul.f32 %v1140_v16, %v620_v40 }
 0x862   : > { %v641_v54 = vmul.f32 %v639_v52, %v632_v18 }
 0x864   : > { %v650_v55 = vadd.f32 %v648_v53, %v641_v54 }
 0x866   : > { %v651_v56 = vpack.c.bf16 %v650_v55, %v650_v55  ;;  %742 = vrot.lane.b32.xlu0 %v650_v55, %s1405_s12 }
 0x868   : > { %657 = vrot.lane.b32.xlu1 %v651_v56, %s1405_s12 }
 0x8da   : > { %v658_v57 = vpop.permute.xlu1 %657 }
 0x8db   : > { %1006 = vmatmul.mubr.msk.bf16.vlgmr.msra.gmra.mrb[0].mxu1 %vm337_vm0, %v658_v57 }
 0x9ae   : > { %v708_v59 = vpop.f32.mrb[0].mxu1 }
 0x9af   : > { %v715_v60 = vmul.f32 0.70710677, %v708_v59  ;;  %v1007_v61 = vpop.f32.mrb[1].mxu1  ;;  %v714_v2 = vmul.f32 0.5, %v708_v59 }
 0x9b0   : > { %v711_v62 = vpop.f32.mrb[2].mxu1 }
 0x9b1   : > { %1141 = verf.f32 %v715_v60  ;;  %v1008_v63 = vpop.f32.mrb[3].mxu1 }
 0x9bb   : > { %v1142_v1 = vpop.eup %1141 }
 0x9bc   : > { %v717_v3 = vadd.f32 1.0, %v1142_v1 }
 0x9be   : > { %v718_v4 = vmul.f32 %v717_v3, %v714_v2 }
 0x9c0   : > { %720 = vrot.lane.b32.xlu1 %v718_v4, %s1404_s14  ;;  %s1291_s14 = scalar_lea.vmem %s1290_s28, 64 }
 0x9c1   : > { %p1293_p7 = scmp.lt.s32.totalorder %s1291_s14, %s1285_s8 }
 0x9c3   : > { %p1294_p4 = por %p1293_p7, %p1292_p5 }
 0x9c5   : > { %p1295_p1 = pnand %p1294_p4, %p1288_p12 }
 0xa32   : > { %v721_v5 = vpop.permute.xlu1 %720 }
 0xa33   : > { %v723_v6 = vmul.f32 %v721_v5, %v708_v59 }
 0xa35   : > { %v724_v7 = vpack.c.bf16 %v723_v6, %v723_v6 }
 0xa37   : > { %1014 = vmatmul.mubr.msk.bf16.vlgmr.msra.gmra.mrb[4].mxu0 %vm337_vm0, %v724_v7 }
 0xa38   : > { %1298 = shalt.err (!%p1295_p1)
}
 0xa39   : > { %s1299_s30 = scalar_lea.hbm %s1754_s9, 32  ;;  %s1303_s7 = scalar_lea.hbm %s1831_s6, 64 }
 0xa3a   : > { %p1300_p3 = scmp.ne.s32.totalorder %s1754_s9, %s1299_s30  ;;  %p1304_p0 = scmp.lt.u32.totalorder %s1754_s9, %s1831_s6 }
 0xa3b   : > { %p1305_p2 = scmp.lt.u32.totalorder %s1303_s7, %s1299_s30  ;;  %p1307_p6 = scmp.lt.u32.totalorder %s1299_s30, %s1754_s9 }
 0xa3c   : > { %p1301_p9 = pnand %p1300_p3, %p1849_p10 }
 0xa3d   : > { %p1306_p8 = por %p1305_p2, %p1304_p0 }
 0xa3e   : > { %p1302_p13 = pneg %p1301_p9 }
 0xa3f   : > { %p1308_p11 = por %p1307_p6, %p1306_p8 }
 0xa41   : > { %p1309_p12 = pnand %p1308_p11, %p1302_p13 }
 0xa43   : > { %1312 = shalt.err (!%p1309_p12)
}
 0xa44   : > { %1036 = dma.vmem_to_hbm [thread:$0]  (%p1849_p10), %s822_s10, 32, %s1754_s9, %s795_s17   ;;  %v743_v8 = vpop.permute.xlu0 %742 }
 0xa45   : > { %s991_s8 = sshll.u32 %s1466_s27, 7  ;;  %s326_s20 = scalar_lea.vmem [#allocation11], %s971_s29 }
 0xa46   : > { %s808_s28 = sshll.u32 %s326_s20, 4  ;;  %s1780_s12 = scalar_lea.hbm %s1830_s5, %s991_s8  ;;  %s1782_s28 = int_to_ptr.vmem [resolvable:$true] %s808_s28 }
 0xa47   : > { %s790_s27 = scalar_lea.sflag [#allocation4], %s1660_s26  ;;  %s1313_s29 = scalar_lea.vmem %s1782_s28, 128 }
 0xa48   : > { %p1314_p5 = scmp.ne.s32.totalorder %s1782_s28, %s1313_s29  ;;  %s1409_s10 = smov [#allocation11]  }
 0xa49   : > { %s1317_s9 = sshll.u32 %s1409_s10, 4  ;;  %s1318_s9 = int_to_ptr.vmem [resolvable:$false] %s1317_s9 }
 0xa4a   : > { %p1315_p7 = pnand %p1314_p5, %p1849_p10  ;;  %s1319_s17 = scalar_lea.vmem %s1318_s9, 256 }
 0xa4b   : > { %p1320_p1 = scmp.lt.s32.totalorder %s1782_s28, %s1318_s9  ;;  %p1321_p3 = scmp.lt.s32.totalorder %s1319_s17, %s1313_s29 }
 0xa4c   : > { %p1316_p4 = pneg %p1315_p7 }
 0xa4d   : > { %p1322_p9 = por %p1321_p3, %p1320_p1 }
 0xa4f   : > { %p1323_p13 = pnand %p1322_p9, %p1316_p4 }
 0xb0a   : > { %v782_v9 = vpop.f32.mrb[4].mxu0 }
 0xb0b   : > { %v783_v10 = vadd.f32 %v782_v9, %v743_v8  ;;  %v1015_v11 = vpop.f32.mrb[5].mxu0 }
 0xb0c   : > { %v785_v12 = vpop.f32.mrb[6].mxu0 }
 0xb0d   : > { %v1016_v13 = vpop.f32.mrb[7].mxu0  ;;  %788 = vst.msk [vmem:[%s326_s20] sm:$0xff] %vm337_vm0, %v783_v10 }
 0xb0e   : > { %1326 = shalt.err (!%p1323_p13)
}
 0xb0f   : > { %s1327_s26 = scalar_lea.hbm %s1780_s12, 128  ;;  %s1331_s16 = scalar_lea.hbm %s1830_s5, 256 }
 0xb10   : > { %p1328_p0 = scmp.ne.s32.totalorder %s1780_s12, %s1327_s26  ;;  %p1332_p6 = scmp.lt.u32.totalorder %s1780_s12, %s1830_s5 }
 0xb11   : > { %p1333_p11 = scmp.lt.u32.totalorder %s1331_s16, %s1327_s26  ;;  %p1335_p5 = scmp.lt.u32.totalorder %s1327_s26, %s1780_s12 }
 0xb12   : > { %p1329_p2 = pnand %p1328_p0, %p1849_p10 }
 0xb13   : > { %p1334_p12 = por %p1333_p11, %p1332_p6 }
 0xb14   : > { %p1330_p8 = pneg %p1329_p2 }
 0xb15   : > { %p1336_p7 = por %p1335_p5, %p1334_p12 }
 0xb17   : > { %p1337_p4 = pnand %p1336_p7, %p1330_p8 }
 0xb19   : > { %1340 = shalt.err (!%p1337_p4)
}
 0xb1a   : > { %1035 = dma.vmem_to_hbm [thread:$0]  (%p1849_p10), %s1782_s28, 128, %s1780_s12, %s790_s27  }
 0xb1b PF: > { %s833_s20 = sand.u32 1, %s1379_s21   ;;  %p1850_p1 = scmp.ne.s32.totalorder %s1842_s25, 0 }
 0xb1c   : > { %p1851_p3 = scmp.ge.s32.totalorder %s1391_s24, 2  ;;  %s834_s14 = scalar_lea.sflag [#allocation4], %s833_s20 }
 0xb1e   : > { %p1057_p9 = pnand %p1851_p3, %p1850_p1 }
 0xb20   : > { %1370 = dma.done.wait (!%p1057_p9), %s834_s14, 128  }
 0xb21   : > { %1372 = vsyncadd (!%p1057_p9), %s834_s14, 4294967168  ;;  %s843_s30 = scalar_lea.sflag [#allocation13], %s833_s20 }
 0xb22   : > { %1374 = dma.done.wait (!%p1057_p9), %s843_s30, 32  }
 0xb23   : > { %1376 = vsyncadd (!%p1057_p9), %s843_s30, 4294967264  ;;  %p25_p10 = scmp.ge.s32.totalorder %s1584_s15, 4   ;;  %s1852_s21 = smov %s1383_s22 }
 0xb24   : > { %s1853_s22 = smov %s1387_s23  ;;  %s1854_s23 = smov %s1595_s18 }
 0xb25   : > { %s1855_s24 = smov %s1584_s15  ;;  %27 = sbr.rel (!%p25_p10) target bundleno = 9 (0x9), region = 118 }
 0xb2c   :  { %848 = vsyncpa [#allocation3], 1 }
 0xb2d   :  { %850 = vsyncpa [#allocation3 + $0x1], 1 }
 0xb2e   :  { %851 = vsyncpa [#allocation6], 1 }
 0xb2f   :  { %852 = vsyncpa [#allocation9], 1 }
 0xb30   :  { %853 = vsyncpa [#allocation4], 1 }
 0xb31   :  { %855 = vsyncpa [#allocation4 + $0x1], 1 }
 0xb32   :  { %856 = vsyncpa [#allocation13], 1 }
 0xb33   :  { %858 = vsyncpa [#allocation13 + $0x1], 1 }

</bundles_post_ra>
